<compile_context>
chip_gen: v5e
topology: v5e:2x2
jax: 0.10.0
libtpu: 0.0.40
codegen_flags: <defaults>
</compile_context>

<pallas_src>
import math
import functools

import jax
import jax.numpy as jnp
from jax import lax
from jax.experimental import pallas as pl
from jax.experimental.pallas import tpu as pltpu


# ----------------------------------------------------------------------------
# tile pickers (respect the (8, 128) block rule; fall back to the full dim)
# ----------------------------------------------------------------------------
def _pick_sublane_tile(dim, preferred):
    t = preferred
    while t >= 8:
        if dim % t == 0:
            return t
        t //= 2
    return dim  # full dim is always a valid block size


def _pick_lane_tile(dim, preferred):
    t = preferred
    while t >= 128:
        if dim % t == 0:
            return t
        t //= 2
    return dim  # full dim is always a valid block size


# ----------------------------------------------------------------------------
# Kernel 1: tiled linear layer  y = x @ W^T + b   (W in PyTorch (Hout, Hin))
# ----------------------------------------------------------------------------
def _linear_kernel(x_ref, w_ref, b_ref, o_ref, acc_ref, *, compute_dtype):
    k = pl.program_id(2)

    @pl.when(k == 0)
    def _():
        acc_ref[...] = jnp.zeros_like(acc_ref)

    x = x_ref[...].astype(compute_dtype)          # (tm, tk)
    w = w_ref[...].astype(compute_dtype)          # (tn, tk)  -- torch layout
    # contract Hin axis of both operands: no transpose materialized.
    acc_ref[...] += lax.dot_general(
        x, w, (((1,), (1,)), ((), ())), preferred_element_type=jnp.float32)

    @pl.when(k == pl.num_programs(2) - 1)
    def _():
        o_ref[...] = (acc_ref[...] + b_ref[...]).astype(o_ref.dtype)


def linear(x2d, weight, bias, *, compute_dtype=jnp.float32,
           tm_pref=256, tn_pref=256, tk_pref=512):
    """x2d: (M, Hin); weight: (Hout, Hin) [PyTorch layout]; bias: (Hout,)."""
    M, Hin = x2d.shape
    Hout = weight.shape[0]
    tm = _pick_sublane_tile(M, tm_pref)
    tn = _pick_lane_tile(Hout, tn_pref)
    tk = _pick_lane_tile(Hin, tk_pref)
    b2d = bias.reshape(1, Hout)

    kernel = functools.partial(_linear_kernel, compute_dtype=compute_dtype)
    cost = pl.CostEstimate(
        flops=2 * M * Hin * Hout,
        transcendentals=0,
        bytes_accessed=4 * (M * Hin + Hin * Hout + M * Hout + Hout),
    )
    return pl.pallas_call(
        kernel,
        out_shape=jax.ShapeDtypeStruct((M, Hout), jnp.float32),
        grid=(M // tm, Hout // tn, Hin // tk),
        in_specs=[
            pl.BlockSpec((tm, tk), lambda i, j, k: (i, k)),
            pl.BlockSpec((tn, tk), lambda i, j, k: (j, k)),
            pl.BlockSpec((1, tn), lambda i, j, k: (0, j)),
        ],
        out_specs=pl.BlockSpec((tm, tn), lambda i, j, k: (i, j)),
        scratch_shapes=[pltpu.VMEM((tm, tn), jnp.float32)],
        compiler_params=pltpu.CompilerParams(
            dimension_semantics=("parallel", "parallel", "arbitrary")),
        cost_estimate=cost,
    )(x2d, weight, b2d)


# ----------------------------------------------------------------------------
# Kernel 2: multi-head attention + fused output projection, packed (B,S,hid)
#   heads are contiguous slices of the last (lane) dim -> no HBM transposes;
#   fc_o is applied in-kernel so the context tensor never hits HBM.
# ----------------------------------------------------------------------------
def _attention_kernel(q_ref, k_ref, v_ref, wo_ref, bo_ref, o_ref, attn_ref, *,
                      n_heads, head_dim, inv_scale, compute_dtype):
    q = q_ref[0]                                  # (tq, hid)
    k = k_ref[0]                                  # (Sk, hid)
    v = v_ref[0]                                  # (Sk, hid)

    # fold 1/sqrt(head_dim) into Q once (instead of dividing the (S,S) energy)
    q_s = (q * inv_scale).astype(compute_dtype)
    k_c = k.astype(compute_dtype)
    v_c = v.astype(compute_dtype)

    ctx_heads = []
    for h in range(n_heads):                      # static unroll (n_heads small)
        lo = h * head_dim
        hi = lo + head_dim
        qh = q_s[:, lo:hi]                        # (tq, hd)
        kh = k_c[:, lo:hi]                        # (Sk, hd)
        vh = v_c[:, lo:hi]                        # (Sk, hd)

        # energy = qh @ kh^T -- contract head_dim of both (no transpose op)
        energy = lax.dot_general(
            qh, kh, (((1,), (1,)), ((), ())),
            preferred_element_type=jnp.float32)   # (tq, Sk)

        # numerically-stable softmax; reciprocal on the EUP slot
        m = jnp.max(energy, axis=-1, keepdims=True)
        e = jnp.exp(energy - m)
        l = jnp.sum(e, axis=-1, keepdims=True)
        attn = e * pl.reciprocal(l, approx=True)

        attn_ref[0, h] = attn
        ctx_heads.append(
            jnp.dot(attn.astype(compute_dtype), vh,
                    preferred_element_type=jnp.float32))

    # heads are contiguous in the last dim, so this concat IS the torch
    # permute(0,2,1,3).view(B,-1,hid) merge (done in-registers, no HBM pass).
    ctx = jnp.concatenate(ctx_heads, axis=-1)     # (tq, hid), f32

    # fused output projection: out = ctx @ Wo^T + bo (torch (Hout, Hin) layout)
    wo = wo_ref[...].astype(compute_dtype)
    out = lax.dot_general(
        ctx.astype(compute_dtype), wo, (((1,), (1,)), ((), ())),
        preferred_element_type=jnp.float32) + bo_ref[...]

    # one lane-dense (tq, hid) store of the final output
    o_ref[0] = out.astype(o_ref.dtype)


def attention_out(q3, k3, v3, wo, bo, n_heads, *,
                  compute_dtype=jnp.float32, tq_pref=128):
    """q3/k3/v3: (B, S, hid) with heads packed in the last dim.
    Returns (out = attention output projected through fc_o, attention)."""
    B, Sq, hid = q3.shape
    Sk = k3.shape[1]
    head_dim = hid // n_heads
    tq = _pick_sublane_tile(Sq, tq_pref)
    inv_scale = 1.0 / math.sqrt(head_dim)
    bo2d = bo.reshape(1, hid)

    kernel = functools.partial(
        _attention_kernel, n_heads=n_heads, head_dim=head_dim,
        inv_scale=inv_scale, compute_dtype=compute_dtype)
    cost = pl.CostEstimate(
        flops=4 * B * n_heads * Sq * Sk * head_dim + 2 * B * Sq * hid * hid,
        transcendentals=B * n_heads * Sq * Sk,
        bytes_accessed=4 * (B * Sq * hid + 2 * B * Sk * hid + hid * hid
                            + B * Sq * hid + B * n_heads * Sq * Sk),
    )
    return pl.pallas_call(
        kernel,
        out_shape=(
            jax.ShapeDtypeStruct((B, Sq, hid), jnp.float32),
            jax.ShapeDtypeStruct((B, n_heads, Sq, Sk), jnp.float32),
        ),
        grid=(B, Sq // tq),
        in_specs=[
            pl.BlockSpec((1, tq, hid), lambda b, qi: (b, qi, 0)),
            pl.BlockSpec((1, Sk, hid), lambda b, qi: (b, 0, 0)),
            pl.BlockSpec((1, Sk, hid), lambda b, qi: (b, 0, 0)),
            pl.BlockSpec((hid, hid), lambda b, qi: (0, 0)),   # Wo stays resident
            pl.BlockSpec((1, hid), lambda b, qi: (0, 0)),     # bo stays resident
        ],
        out_specs=(
            pl.BlockSpec((1, tq, hid), lambda b, qi: (b, qi, 0)),
            pl.BlockSpec((1, n_heads, tq, Sk), lambda b, qi: (b, 0, qi, 0)),
        ),
        compiler_params=pltpu.CompilerParams(
            dimension_semantics=("parallel", "parallel")),
        cost_estimate=cost,
    )(q3, k3, v3, wo, bo2d)


# ----------------------------------------------------------------------------
# Full forward
# ----------------------------------------------------------------------------
def multi_head_attention(params, query, key, value, n_heads, mask=None,
                         *, compute_dtype=jnp.float32):
    # TODO(synk): masked_fill path (mask != None) not implemented.
    assert mask is None
    B, Sq, hid = query.shape
    Sk = key.shape[1]

    if (query is key) and (key is value):
        # self-attention: fused QKV projection -- one pass over the input.
        qkv = linear(query.reshape(B * Sq, hid), params["w_qkv"],
                     params["b_qkv"], compute_dtype=compute_dtype)
        Q = qkv[:, 0 * hid:1 * hid].reshape(B, Sq, hid)
        K = qkv[:, 1 * hid:2 * hid].reshape(B, Sk, hid)
        V = qkv[:, 2 * hid:3 * hid].reshape(B, Sk, hid)
    else:
        # cross-attention: separate projections (inputs differ).
        Q = linear(query.reshape(B * Sq, hid), params["wq"], params["bq"],
                   compute_dtype=compute_dtype).reshape(B, Sq, hid)
        K = linear(key.reshape(B * Sk, hid), params["wk"], params["bk"],
                   compute_dtype=compute_dtype).reshape(B, Sk, hid)
        V = linear(value.reshape(B * Sk, hid), params["wv"], params["bv"],
                   compute_dtype=compute_dtype).reshape(B, Sk, hid)

    # heads stay packed in the lane dim; fc_o is fused into the attention
    # kernel so the context never round-trips through HBM.
    out, attn = attention_out(Q, K, V, params["wo"], params["bo"], n_heads,
                              compute_dtype=compute_dtype)
    return out, attn


# ----------------------------------------------------------------------------
# Params (PyTorch nn.Linear layout) + one-time QKV fusion
# ----------------------------------------------------------------------------
def init_params(key, hid_dim):
    ks = jax.random.split(key, 8)
    bound = 1.0 / math.sqrt(hid_dim)   # nn.Linear default init range
    w = lambda k: jax.random.uniform(k, (hid_dim, hid_dim), jnp.float32,
                                     -bound, bound)
    b = lambda k: jax.random.uniform(k, (hid_dim,), jnp.float32, -bound, bound)
    return {
        "wq": w(ks[0]), "bq": b(ks[1]),
        "wk": w(ks[2]), "bk": b(ks[3]),
        "wv": w(ks[4]), "bv": b(ks[5]),
        "wo": w(ks[6]), "bo": b(ks[7]),
    }


def prepare_params(p):
    """Pre-concatenate Q/K/V weights once (not per forward call)."""
    fused = dict(p)
    fused["w_qkv"] = jnp.concatenate([p["wq"], p["wk"], p["wv"]], axis=0)
    fused["b_qkv"] = jnp.concatenate([p["bq"], p["bk"], p["bv"]], axis=0)
    return fused


# ----------------------------------------------------------------------------
# Demo + verification
# ----------------------------------------------------------------------------
if __name__ == "__main__":
    # small shapes consistent with the module: batch=2, seq=8, hid_dim=32, heads=4
    B, S, HID, NHEADS = 2, 8, 32, 4

    root = jax.random.PRNGKey(0)
    kp, kx, kq, kk, kv = jax.random.split(root, 5)

    raw_params = init_params(kp, HID)
    params = prepare_params(raw_params)

    def ref_forward(p, q, k, v):
        hd = HID // NHEADS
        Q = q @ p["wq"].T + p["bq"]
        K = k @ p["wk"].T + p["bk"]
        V = v @ p["wv"].T + p["bv"]
        Q = Q.reshape(B, -1, NHEADS, hd).transpose(0, 2, 1, 3)
        K = K.reshape(B, -1, NHEADS, hd).transpose(0, 2, 1, 3)
        V = V.reshape(B, -1, NHEADS, hd).transpose(0, 2, 1, 3)
        energy = jnp.einsum("bhqd,bhkd->bhqk", Q, K) / math.sqrt(hd)
        a = jax.nn.softmax(energy, axis=-1)
        x = jnp.einsum("bhqk,bhkd->bhqd", a, V)
        x = x.transpose(0, 2, 1, 3).reshape(B, -1, HID)
        return x @ p["wo"].T + p["bo"], a

    # --- self-attention (fused QKV path) -----------------------------------
    x = jax.random.normal(kx, (B, S, HID), jnp.float32)
    out_sa, attn_sa = multi_head_attention(params, x, x, x, NHEADS)
    jax.block_until_ready(out_sa)
    jax.block_until_ready(attn_sa)
    out_ref, attn_ref = ref_forward(raw_params, x, x, x)
    assert out_sa.shape == (B, S, HID) and attn_sa.shape == (B, NHEADS, S, S)
    assert jnp.allclose(attn_sa, attn_ref, atol=5e-3, rtol=5e-3)
    assert jnp.allclose(out_sa, out_ref, atol=1e-2, rtol=1e-2)

    # --- cross-attention (separate projections path) -----------------------
    query = jax.random.normal(kq, (B, S, HID), jnp.float32)
    key_in = jax.random.normal(kk, (B, S, HID), jnp.float32)
    value = jax.random.normal(kv, (B, S, HID), jnp.float32)
    out_ca, attn_ca = multi_head_attention(params, query, key_in, value, NHEADS)
    jax.block_until_ready(out_ca)
    jax.block_until_ready(attn_ca)
    out_ref2, attn_ref2 = ref_forward(raw_params, query, key_in, value)
    assert jnp.allclose(attn_ca, attn_ref2, atol=5e-3, rtol=5e-3)
    assert jnp.allclose(out_ca, out_ref2, atol=1e-2, rtol=1e-2)

    print("KERNEL_OK")
</pallas_src>

<mosaic_0001>
module attributes {stable_mosaic.version = 11 : i64} {
  func.func @_linear_kernel(%arg0: i32, %arg1: i32, %arg2: i32, %arg3: memref<16x32xf32, #tpu.memory_space<vmem>>, %arg4: memref<96x32xf32, #tpu.memory_space<vmem>>, %arg5: memref<1x96xf32, #tpu.memory_space<vmem>>, %arg6: memref<16x96xf32, #tpu.memory_space<vmem>>, %arg7: memref<16x96xf32, #tpu.memory_space<vmem>>) attributes {dimension_semantics = [#tpu.dimension_semantics<parallel>, #tpu.dimension_semantics<parallel>, #tpu.dimension_semantics<arbitrary>], iteration_bounds = array<i64: 1, 1, 1>, scalar_prefetch = 0 : i64, scratch_operands = 1 : i64, tpu.core_type = #tpu.core_type<tc>, window_params = [{transform_indices = @transform_0, window_bounds = array<i64: 16, 32>}, {transform_indices = @transform_1, window_bounds = array<i64: 96, 32>}, {transform_indices = @transform_2, window_bounds = array<i64: 1, 96>}, {transform_indices = @transform_3, window_bounds = array<i64: 16, 96>}]} {
    %c0_i32 = arith.constant 0 : i32
    %0 = arith.cmpi eq, %arg2, %c0_i32 : i32
    %1 = arith.extui %0 : i1 to i32
    %c0_i32_0 = arith.constant 0 : i32
    %2 = arith.cmpi ne, %1, %c0_i32_0 : i32
    scf.if %2 {
      %cst_10 = arith.constant 0.000000e+00 : f32
      %12 = vector.broadcast %cst_10 : f32 to vector<16x96xf32>
      %c0_11 = arith.constant 0 : index
      %c0_12 = arith.constant 0 : index
      %13 = vector.load %arg7[%c0_11, %c0_12] : memref<16x96xf32, #tpu.memory_space<vmem>>, vector<16x96xf32>
      tpu.vector_store %arg7[%c0_11, %c0_12], %12 {strides = array<i32>} : memref<16x96xf32, #tpu.memory_space<vmem>>, vector<16x96xf32>,
    } else {
    }
    %c0 = arith.constant 0 : index
    %c0_1 = arith.constant 0 : index
    %3 = vector.load %arg3[%c0, %c0_1] : memref<16x32xf32, #tpu.memory_space<vmem>>, vector<16x32xf32>
    %c0_2 = arith.constant 0 : index
    %c0_3 = arith.constant 0 : index
    %4 = vector.load %arg4[%c0_2, %c0_3] : memref<96x32xf32, #tpu.memory_space<vmem>>, vector<96x32xf32>
    %c0_4 = arith.constant 0 : index
    %c0_5 = arith.constant 0 : index
    %5 = vector.load %arg7[%c0_4, %c0_5] : memref<16x96xf32, #tpu.memory_space<vmem>>, vector<16x96xf32>
    %cst = arith.constant dense<0.000000e+00> : vector<16x96xf32>
    %6 = tpu.matmul %3, %4, %cst {dimension_numbers = #tpu.dot_dimension_numbers<[1], [1], [0], [0], [0, 0, 1, 0], [], []>} : vector<16x32xf32>, vector<96x32xf32>, vector<16x96xf32> -> vector<16x96xf32>
    %7 = arith.addf %5, %6 : vector<16x96xf32>
    %c0_6 = arith.constant 0 : index
    %c0_7 = arith.constant 0 : index
    %8 = vector.load %arg7[%c0_6, %c0_7] : memref<16x96xf32, #tpu.memory_space<vmem>>, vector<16x96xf32>
    tpu.vector_store %arg7[%c0_6, %c0_7], %7 {strides = array<i32>} : memref<16x96xf32, #tpu.memory_space<vmem>>, vector<16x96xf32>,
    %c0_i32_8 = arith.constant 0 : i32
    %9 = arith.cmpi eq, %arg2, %c0_i32_8 : i32
    %10 = arith.extui %9 : i1 to i32
    %c0_i32_9 = arith.constant 0 : i32
    %11 = arith.cmpi ne, %10, %c0_i32_9 : i32
    scf.if %11 {
      %c0_10 = arith.constant 0 : index
      %c0_11 = arith.constant 0 : index
      %12 = vector.load %arg7[%c0_10, %c0_11] : memref<16x96xf32, #tpu.memory_space<vmem>>, vector<16x96xf32>
      %c0_12 = arith.constant 0 : index
      %c0_13 = arith.constant 0 : index
      %13 = vector.load %arg5[%c0_12, %c0_13] : memref<1x96xf32, #tpu.memory_space<vmem>>, vector<1x96xf32>
      %14 = vector.broadcast %13 : vector<1x96xf32> to vector<16x96xf32>
      %15 = arith.addf %12, %14 : vector<16x96xf32>
      %c0_14 = arith.constant 0 : index
      %c0_15 = arith.constant 0 : index
      %16 = vector.load %arg6[%c0_14, %c0_15] : memref<16x96xf32, #tpu.memory_space<vmem>>, vector<16x96xf32>
      tpu.vector_store %arg6[%c0_14, %c0_15], %15 {strides = array<i32>} : memref<16x96xf32, #tpu.memory_space<vmem>>, vector<16x96xf32>,
    } else {
    }
    return
  }
  func.func @transform_0(%arg0: i32, %arg1: i32, %arg2: i32) -> (i32, i32) {
    %c0_i32 = arith.constant 0 : i32
    return %arg0, %arg2 : i32, i32
  }
  func.func @transform_1(%arg0: i32, %arg1: i32, %arg2: i32) -> (i32, i32) {
    %c0_i32 = arith.constant 0 : i32
    return %arg1, %arg2 : i32, i32
  }
  func.func @transform_2(%arg0: i32, %arg1: i32, %arg2: i32) -> (i32, i32) {
    %c0_i32 = arith.constant 0 : i32
    %c0_i32_0 = arith.constant 0 : i32
    return %c0_i32, %arg1 : i32, i32
  }
  func.func @transform_3(%arg0: i32, %arg1: i32, %arg2: i32) -> (i32, i32) {
    %c0_i32 = arith.constant 0 : i32
    return %arg0, %arg1 : i32, i32
  }
}

</mosaic_0001>

<bundles_post_ra>
// kernel: tpu_custom_call.1
= control target key start
LH: loop header
LB: loop body
LE: loop exit
PB: predicated region body
PF: predicated region fallthrough
CT: control target
= control target key end

     0   :  { %vm38_vm0 = vcmask 261120   ;;  %s301_s0 = inlined_call_operand.vmem [shape: f32[16,32], index: 0, kind: input, shape index: {}]   ;;  %s302_s1 = inlined_call_operand.vmem [shape: f32[96,32], index: 1, kind: input, shape index: {}]   ;;  %s303_s2 = inlined_call_operand.vmem [shape: f32[1,96], index: 2, kind: input, shape index: {}]   ;;  %s304_s3 = inlined_call_operand.hbm [shape: f32[16,96], index: 3, kind: output, shape index: {}]  }
   0x1   :  { %v35_v0 = vld [vmem:[%s302_s1 + $0x58] sm:$0xff]  ;;  %v34_v1 = vld [vmem:[%s302_s1 + $0x50] sm:$0xff] }
   0x2   :  { %140 = vmatpush.xpose.msk.msra.mxu0 %vm38_vm0, %v35_v0  ;;  %154 = vmatpush.xpose.msk.msra.mxu1 %vm38_vm0, %v35_v0 }
   0x3   :  { %8 = vsyncpa [#allocation4], 0  ;;  %v33_v2 = vld [vmem:[%s302_s1 + $0x48] sm:$0xff]  ;;  %v32_v3 = vld [vmem:[%s302_s1 + $0x40] sm:$0xff]  ;;  %vm19_vm1 = vcmask 785408   ;;  %v197_v5 = vmov 0.0  }
   0x4   :  { %v31_v4 = vld [vmem:[%s302_s1 + $0x38] sm:$0xff]  ;;  %20 = vst.msk [vmem:[#allocation2] sm:$0xff] %vm19_vm1, %v197_v5  ;;  %v30_v6 = vld [vmem:[%s302_s1 + $0x30] sm:$0xff]  ;;  %v29_v7 = vld [vmem:[%s302_s1 + $0x28] sm:$0xff]  ;;  %s198_s14 = smov [#allocation3]   ;;  %s128_s17 = sshll.u32 %s304_s3, 4  ;;  %s129_s17 = int_to_ptr.hbm [resolvable:$true] %s128_s17 }
   0x5   :  { %21 = vst.msk [vmem:[#allocation2 + $0x8] sm:$0xff] %vm19_vm1, %v197_v5  ;;  %v28_v8 = vld [vmem:[%s302_s1 + $0x20] sm:$0xff]  ;;  %v27_v9 = vld [vmem:[%s302_s1 + $0x18] sm:$0xff]  ;;  %v26_v10 = vld [vmem:[%s302_s1 + $0x10] sm:$0xff]  ;;  %s199_s18 = smov 128   ;;  %s200_s19 = smov 8  }
   0x6   :  { %141 = vmatpush.xpose.msk.msra.mxu0 %vm38_vm0, %v34_v1  ;;  %155 = vmatpush.xpose.msk.msra.mxu1 %vm38_vm0, %v34_v1  ;;  %v25_v11 = vld [vmem:[%s302_s1 + $0x8] sm:$0xff]  ;;  %v24_v12 = vld [vmem:[%s302_s1] sm:$0xff] }
   0x7   :  { %v22_v13 = vld [vmem:[%s301_s0] sm:$0xff]  ;;  %v23_v14 = vld [vmem:[%s301_s0 + $0x8] sm:$0xff]  ;;  %s126_s0 = sshll.u32 %s198_s14, 4  ;;  %s127_s0 = int_to_ptr.vmem [resolvable:$true] %s126_s0 }
   0x8   :  { %v170_v21 = vld [vmem:[%s303_s2] ss:$0 sm:$0xff] }
   0xa   :  { %142 = vmatpush.xpose.msk.msra.mxu0 %vm38_vm0, %v33_v2  ;;  %156 = vmatpush.xpose.msk.msra.mxu1 %vm38_vm0, %v33_v2 }
   0xb   :  { %v36_v15 = vld [vmem:[#allocation2] sm:$0xff] }
   0xc   :  { %v37_v16 = vld [vmem:[#allocation2 + $0x8] sm:$0xff] }
   0xe   :  { %143 = vmatpush.xpose.msk.msra.mxu0 %vm38_vm0, %v32_v3  ;;  %157 = vmatpush.xpose.msk.msra.mxu1 %vm38_vm0, %v32_v3 }
  0x12   :  { %144 = vmatpush.xpose.msk.msra.mxu0 %vm38_vm0, %v31_v4  ;;  %158 = vmatpush.xpose.msk.msra.mxu1 %vm38_vm0, %v31_v4 }
  0x16   :  { %145 = vmatpush.xpose.msk.msra.mxu0 %vm38_vm0, %v30_v6  ;;  %159 = vmatpush.xpose.msk.msra.mxu1 %vm38_vm0, %v30_v6 }
  0x1a   :  { %146 = vmatpush.xpose.msk.msra.mxu0 %vm38_vm0, %v29_v7  ;;  %160 = vmatpush.xpose.msk.msra.mxu1 %vm38_vm0, %v29_v7 }
  0x1e   :  { %147 = vmatpush.xpose.msk.msra.mxu0 %vm38_vm0, %v28_v8  ;;  %161 = vmatpush.xpose.msk.msra.mxu1 %vm38_vm0, %v28_v8 }
  0x22   :  { %148 = vmatpush.xpose.msk.msra.mxu0 %vm38_vm0, %v27_v9  ;;  %162 = vmatpush.xpose.msk.msra.mxu1 %vm38_vm0, %v27_v9 }
  0x26   :  { %149 = vmatpush.xpose.msk.msra.mxu0 %vm38_vm0, %v26_v10  ;;  %163 = vmatpush.xpose.msk.msra.mxu1 %vm38_vm0, %v26_v10 }
  0x2a   :  { %150 = vmatpush.xpose.msk.msra.mxu0 %vm38_vm0, %v25_v11  ;;  %164 = vmatpush.xpose.msk.msra.mxu1 %vm38_vm0, %v25_v11 }
  0x2e   :  { %151 = vmatpush.xpose.msk.msra.mxu0 %vm38_vm0, %v24_v12  ;;  %165 = vmatpush.xpose.msk.msra.mxu1 %vm38_vm0, %v24_v12 }
  0x31   :  { %152 = vmatmul.msk.f32.vlgmr.msra.gmra.mxu0 %vm38_vm0, %v22_v13  ;;  %153 = vmatmul.msk.f32.vlgmr.msra.gmra.mxu1 %vm38_vm0, %v23_v14 }
  0xae   :  { %v98_v17 = vpop.f32.mrf.mxu0  ;;  %v101_v18 = vpop.f32.mrf.mxu1 }
  0xaf   :  { %v104_v19 = vadd.f32 %v98_v17, %v36_v15  ;;  %v105_v20 = vadd.f32 %v101_v18, %v37_v16 }
  0xb1   :  { %107 = vst.msk [vmem:[#allocation2] sm:$0xff] %vm19_vm1, %v104_v19 }
  0xb2   :  { %108 = vst.msk [vmem:[#allocation2 + $0x8] sm:$0xff] %vm19_vm1, %v105_v20 }
  0xb8   :  { %v112_v22 = vld [vmem:[#allocation2] sm:$0xff] }
  0xb9   :  { %v113_v23 = vld [vmem:[#allocation2 + $0x8] sm:$0xff]  ;;  %v118_v24 = vadd.f32 %v170_v21, %v112_v22 }
  0xba   :  { %v119_v25 = vadd.f32 %v170_v21, %v113_v23 }
  0xbb   :  { %120 = vst.msk [vmem:[#allocation3] sm:$0xff] %vm19_vm1, %v118_v24 }
  0xbc   :  { %121 = vst.msk [vmem:[#allocation3 + $0x8] sm:$0xff] %vm19_vm1, %v119_v25 }
  0xbd   :  { %134 = dma.vmem_to_hbm [thread:$0]  %s127_s0, 256, %s129_s17, [#allocation4], %s199_s18, %s199_s18, %s200_s19  }
  0xbe   :  { %195 = dma.done.wait [#allocation4], 256  }
  0xbf   :  { %196 = vsyncadd [#allocation4], 4294967040 }
  0xc0   :  { %139 = vsyncpa [#allocation4], 1 }

</bundles_post_ra>
